<compile_context>
chip_gen: v6e
topology: v6e:2x2x1
jax: 0.10.0
libtpu: 0.0.40
codegen_flags: <defaults>
</compile_context>

<pallas_src>
import jax
import jax.numpy as jnp
from jax.experimental import pallas as pl
from jax.experimental.pallas import tpu as pltpu


def garo_kernel(x_ref, wqt_ref, bq_ref, wkt_ref, bk_ref, out_ref, attn_ref):
    """One grid step processes TB batch elements.

    x_ref    : (TB, N, H)  node features (f32 or bf16)
    wqt_ref  : (H, D)      query weights, pre-transposed, pre-scaled by 1/sqrt(D)
    bq_ref   : (1, D)      query bias, pre-scaled by 1/sqrt(D)
    wkt_ref  : (H, D)      key weights, pre-transposed
    bk_ref   : (1, D)      key bias
    out_ref  : (1, TB, H)  gated node-mean readout
    attn_ref : (1, TB, N)  sigmoid attention map (lane-dense, N on lanes)
    """
    x = x_ref[...].astype(jnp.float32)          # upcast once; f32 compute/accumulate
    tb, n, h = x.shape
    d = wqt_ref.shape[-1]
    inv_n = jnp.float32(1.0 / n)

    # Node mean -> (TB, H); 1/N folded into a single multiply.
    m = jnp.sum(x, axis=1) * inv_n

    # Query projection for all TB rows at once (one MXU matmul, M = TB).
    # 1/sqrt(D) is already folded into wqt / bq.
    q = jnp.dot(m, wqt_ref[...],
                preferred_element_type=jnp.float32) + bq_ref[...]          # (TB, D)

    # Key projection for all TB*N nodes at once (one large MXU matmul).
    k = jnp.dot(x.reshape(tb * n, h), wkt_ref[...],
                preferred_element_type=jnp.float32) + bk_ref[...]          # (TB*N, D)
    k = k.reshape(tb, n, d)

    # Scaled dot-product scores with no transposes:
    # VPU multiply + one XLU lane reduce, then one sigmoid (EUP).
    scores = jnp.sum(q[:, None, :] * k, axis=-1)                           # (TB, N)
    gate = jax.nn.sigmoid(scores)                                          # (TB, N)

    # Attention map output (N on lanes) -- identical values to the gate.
    attn_ref[0] = gate.astype(attn_ref.dtype)

    # Gated node-mean readout: broadcast gate over H, sum over nodes, scale by 1/N.
    out_ref[0] = (jnp.sum(x * gate[:, :, None], axis=1) * inv_n).astype(out_ref.dtype)


def _pick_block_batch(B, N, H, itemsize, budget_bytes=2 * 1024 * 1024):
    """Largest divisor of B whose x tile fits the per-buffer VMEM budget.

    Also keeps the grid length >= 2 when possible so the batch axis can shard
    across the 2 TensorCores of a v7x chip ("parallel" dimension semantics).
    The ~2 MiB per-buffer budget keeps double-buffered tiles comfortably under
    the default scoped VMEM of every generation (16/32/32 MiB on v5e/v6e/v7x).
    """
    per_batch = max(1, N * H * itemsize)
    cap = max(1, budget_bytes // per_batch)
    if B >= 2:
        cap = min(cap, B // 2)
    tb = 1
    for d in range(1, B + 1):
        if B % d == 0 and d <= cap:
            tb = d
    return tb


def garo_forward(x, wq, bq, wk, bk, *, block_batch=None, compute_in_bf16=False):
    """x: (B, N, H); wq/wk: (D, H); bq/bk: (D,) or (1, D).

    Returns (out (B, H) f32, attn (B, 1, N) f32) -- matching the PyTorch
    forward in eval mode (dropout == identity).
    """
    B, N, H = x.shape
    D = wq.shape[0]

    # Pre-transpose weights (removes two in-kernel XLU transposes) and fold the
    # 1/sqrt(D) attention scale into the query projection (free on host/XLA).
    scale = jnp.float32(1.0 / (float(D) ** 0.5))
    wqt = (wq.astype(jnp.float32).T * scale)                 # (H, D)
    bqs = jnp.reshape(bq, (1, D)).astype(jnp.float32) * scale
    wkt = wk.astype(jnp.float32).T                           # (H, D)
    bk2 = jnp.reshape(bk, (1, D)).astype(jnp.float32)

    if compute_in_bf16:
        # Halves HBM bytes for the dominant x read; kernel upcasts to f32.
        x = x.astype(jnp.bfloat16)

    TB = block_batch or _pick_block_batch(B, N, H, x.dtype.itemsize)
    assert B % TB == 0, "block_batch must divide the batch dimension"
    G = B // TB

    out3, attn3 = pl.pallas_call(
        garo_kernel,
        out_shape=(
            jax.ShapeDtypeStruct((G, TB, H), jnp.float32),
            jax.ShapeDtypeStruct((G, TB, N), jnp.float32),
        ),
        grid=(G,),
        in_specs=[
            pl.BlockSpec((TB, N, H), lambda b: (b, 0, 0)),   # x: TB batches / step
            pl.BlockSpec((H, D), lambda b: (0, 0)),          # Wq^T * (1/sqrt(D))
            pl.BlockSpec((1, D), lambda b: (0, 0)),          # bq * (1/sqrt(D))
            pl.BlockSpec((H, D), lambda b: (0, 0)),          # Wk^T
            pl.BlockSpec((1, D), lambda b: (0, 0)),          # bk
        ],
        out_specs=(
            pl.BlockSpec((1, TB, H), lambda b: (b, 0, 0)),   # pooled readout
            pl.BlockSpec((1, TB, N), lambda b: (b, 0, 0)),   # attention map
        ),
        compiler_params=pltpu.CompilerParams(
            dimension_semantics=("parallel",),
            vmem_limit_bytes=32 * 1024 * 1024,
        ),
    )(x, wqt, bqs, wkt, bk2)

    out = out3.reshape(B, H)
    attn = attn3.reshape(B, N)[:, None, :]                   # (B, 1, N)
    return out, attn


def reference_forward(x, wq, bq, wk, bk):
    """Plain-JAX reference mirroring the PyTorch forward (eval mode)."""
    m = jnp.mean(x, axis=-2)                                 # (B, H)
    q = m @ wq.T + bq                                        # (B, D)
    k = jnp.einsum("bnh,dh->bnd", x, wk) + bk                # (B, N, D)
    scores = jnp.einsum("bd,bnd->bn", q, k) / jnp.sqrt(jnp.float32(q.shape[-1]))
    attn = jax.nn.sigmoid(scores)[:, None, :]                # (B, 1, N)
    out = jnp.mean(x * jnp.swapaxes(attn, -1, -2), axis=-2)  # (B, H)
    return out, attn


if __name__ == "__main__":
    # Small deterministic config: batch_main=16, nodes=16, hidden=32, upscale=1.0
    B, N, H = 16, 16, 32
    D = H  # round(upscale * hidden_dim) with upscale=1.0

    key = jax.random.PRNGKey(0)
    kx, kwq, kbq, kwk, kbk = jax.random.split(key, 5)

    x = jax.random.normal(kx, (B, N, H), dtype=jnp.float32)

    # nn.Linear-style deterministic init: U(-1/sqrt(in), 1/sqrt(in))
    bound = 1.0 / (H ** 0.5)
    wq = jax.random.uniform(kwq, (D, H), jnp.float32, -bound, bound)
    bq = jax.random.uniform(kbq, (D,), jnp.float32, -bound, bound)
    wk = jax.random.uniform(kwk, (D, H), jnp.float32, -bound, bound)
    bk = jax.random.uniform(kbk, (D,), jnp.float32, -bound, bound)

    # f32 path: exact check against the reference.
    out, attn = garo_forward(x, wq, bq, wk, bk)
    jax.block_until_ready((out, attn))

    ref_out, ref_attn = reference_forward(x, wq, bq, wk, bk)
    assert out.shape == (B, H) and attn.shape == (B, 1, N)
    assert jnp.allclose(out, ref_out, atol=1e-5, rtol=1e-5)
    assert jnp.allclose(attn, ref_attn, atol=1e-5, rtol=1e-5)

    # bf16-input path (halves HBM traffic for the x read; f32 accumulate in-kernel).
    out_bf, attn_bf = garo_forward(x, wq, bq, wk, bk, compute_in_bf16=True)
    jax.block_until_ready((out_bf, attn_bf))
    assert out_bf.shape == (B, H) and attn_bf.shape == (B, 1, N)
    assert jnp.allclose(out_bf, ref_out, atol=5e-2, rtol=5e-2)
    assert jnp.allclose(attn_bf, ref_attn, atol=5e-2, rtol=5e-2)

    print("KERNEL_OK")
</pallas_src>

<mosaic_0001>
module attributes {stable_mosaic.version = 11 : i64} {
  func.func @garo_kernel(%arg0: i32, %arg1: memref<8x16x32xf32, #tpu.memory_space<vmem>>, %arg2: memref<32x32xf32, #tpu.memory_space<vmem>>, %arg3: memref<1x32xf32, #tpu.memory_space<vmem>>, %arg4: memref<32x32xf32, #tpu.memory_space<vmem>>, %arg5: memref<1x32xf32, #tpu.memory_space<vmem>>, %arg6: memref<1x8x32xf32, #tpu.memory_space<vmem>>, %arg7: memref<1x8x16xf32, #tpu.memory_space<vmem>>) attributes {dimension_semantics = [#tpu.dimension_semantics<parallel>], iteration_bounds = array<i64: 2>, scalar_prefetch = 0 : i64, scratch_operands = 0 : i64, tpu.core_type = #tpu.core_type<tc>, window_params = [{transform_indices = @transform_0, window_bounds = array<i64: 8, 16, 32>}, {pipeline_mode = #tpu.pipeline_mode<synchronous>, transform_indices = @transform_1, window_bounds = array<i64: 32, 32>}, {pipeline_mode = #tpu.pipeline_mode<synchronous>, transform_indices = @transform_2, window_bounds = array<i64: 1, 32>}, {pipeline_mode = #tpu.pipeline_mode<synchronous>, transform_indices = @transform_3, window_bounds = array<i64: 32, 32>}, {pipeline_mode = #tpu.pipeline_mode<synchronous>, transform_indices = @transform_4, window_bounds = array<i64: 1, 32>}, {transform_indices = @transform_5, window_bounds = array<i64: 1, 8, 32>}, {transform_indices = @transform_6, window_bounds = array<i64: 1, 8, 16>}]} {
    %c0 = arith.constant 0 : index
    %c0_0 = arith.constant 0 : index
    %c0_1 = arith.constant 0 : index
    %0 = vector.load %arg1[%c0, %c0_0, %c0_1] : memref<8x16x32xf32, #tpu.memory_space<vmem>>, vector<8x16x32xf32>
    %cst = arith.constant dense<0.000000e+00> : vector<8x32xf32>
    %1 = vector.multi_reduction <add>, %0, %cst [1] : vector<8x16x32xf32> to vector<8x32xf32>
    %cst_2 = arith.constant 6.250000e-02 : f32
    %2 = vector.broadcast %cst_2 : f32 to vector<8x32xf32>
    %3 = arith.mulf %1, %2 : vector<8x32xf32>
    %c0_3 = arith.constant 0 : index
    %c0_4 = arith.constant 0 : index
    %4 = vector.load %arg2[%c0_3, %c0_4] : memref<32x32xf32, #tpu.memory_space<vmem>>, vector<32x32xf32>
    %cst_5 = arith.constant dense<0.000000e+00> : vector<8x32xf32>
    %5 = tpu.matmul %3, %4, %cst_5 {dimension_numbers = #tpu.dot_dimension_numbers<[1], [0], [0], [1], [0, 0, 1, 1], [], []>} : vector<8x32xf32>, vector<32x32xf32>, vector<8x32xf32> -> vector<8x32xf32>
    %c0_6 = arith.constant 0 : index
    %c0_7 = arith.constant 0 : index
    %6 = vector.load %arg3[%c0_6, %c0_7] : memref<1x32xf32, #tpu.memory_space<vmem>>, vector<1x32xf32>
    %7 = vector.broadcast %6 : vector<1x32xf32> to vector<8x32xf32>
    %8 = arith.addf %5, %7 : vector<8x32xf32>
    %9 = vector.shape_cast %0 : vector<8x16x32xf32> to vector<128x32xf32>
    %c0_8 = arith.constant 0 : index
    %c0_9 = arith.constant 0 : index
    %10 = vector.load %arg4[%c0_8, %c0_9] : memref<32x32xf32, #tpu.memory_space<vmem>>, vector<32x32xf32>
    %cst_10 = arith.constant dense<0.000000e+00> : vector<128x32xf32>
    %11 = tpu.matmul %9, %10, %cst_10 {dimension_numbers = #tpu.dot_dimension_numbers<[1], [0], [0], [1], [0, 0, 1, 1], [], []>} : vector<128x32xf32>, vector<32x32xf32>, vector<128x32xf32> -> vector<128x32xf32>
    %c0_11 = arith.constant 0 : index
    %c0_12 = arith.constant 0 : index
    %12 = vector.load %arg5[%c0_11, %c0_12] : memref<1x32xf32, #tpu.memory_space<vmem>>, vector<1x32xf32>
    %13 = vector.broadcast %12 : vector<1x32xf32> to vector<128x32xf32>
    %14 = arith.addf %11, %13 : vector<128x32xf32>
    %15 = vector.shape_cast %14 : vector<128x32xf32> to vector<8x16x32xf32>
    %16 = vector.shape_cast %8 : vector<8x32xf32> to vector<8x1x32xf32>
    %17 = vector.broadcast %16 : vector<8x1x32xf32> to vector<8x16x32xf32>
    %18 = arith.mulf %17, %15 : vector<8x16x32xf32>
    %cst_13 = arith.constant dense<0.000000e+00> : vector<8x16xf32>
    %19 = vector.multi_reduction <add>, %18, %cst_13 [2] : vector<8x16x32xf32> to vector<8x16xf32>
    %20 = arith.negf %19 : vector<8x16xf32>
    %21 = math.exp %20 : vector<8x16xf32>
    %cst_14 = arith.constant 1.000000e+00 : f32
    %22 = vector.broadcast %cst_14 : f32 to vector<8x16xf32>
    %23 = arith.addf %22, %21 : vector<8x16xf32>
    %24 = arith.divf %22, %23 : vector<8x16xf32>
    %c0_15 = arith.constant 0 : index
    %c0_16 = arith.constant 0 : index
    %c0_17 = arith.constant 0 : index
    %25 = vector.load %arg7[%c0_15, %c0_16, %c0_17] : memref<1x8x16xf32, #tpu.memory_space<vmem>>, vector<1x8x16xf32>
    %26 = vector.shape_cast %25 : vector<1x8x16xf32> to vector<8x16xf32>
    %27 = vector.shape_cast %24 : vector<8x16xf32> to vector<1x8x16xf32>
    tpu.vector_store %arg7[%c0_15, %c0_16, %c0_17], %27 {strides = array<i32>} : memref<1x8x16xf32, #tpu.memory_space<vmem>>, vector<1x8x16xf32>,
    %28 = vector.shape_cast %24 : vector<8x16xf32> to vector<8x16x1xf32>
    %29 = vector.broadcast %28 : vector<8x16x1xf32> to vector<8x16x32xf32>
    %30 = arith.mulf %0, %29 : vector<8x16x32xf32>
    %cst_18 = arith.constant dense<0.000000e+00> : vector<8x32xf32>
    %31 = vector.multi_reduction <add>, %30, %cst_18 [1] : vector<8x16x32xf32> to vector<8x32xf32>
    %cst_19 = arith.constant 6.250000e-02 : f32
    %32 = vector.broadcast %cst_19 : f32 to vector<8x32xf32>
    %33 = arith.mulf %31, %32 : vector<8x32xf32>
    %c0_20 = arith.constant 0 : index
    %c0_21 = arith.constant 0 : index
    %c0_22 = arith.constant 0 : index
    %34 = vector.load %arg6[%c0_20, %c0_21, %c0_22] : memref<1x8x32xf32, #tpu.memory_space<vmem>>, vector<1x8x32xf32>
    %35 = vector.shape_cast %34 : vector<1x8x32xf32> to vector<8x32xf32>
    %36 = vector.shape_cast %33 : vector<8x32xf32> to vector<1x8x32xf32>
    tpu.vector_store %arg6[%c0_20, %c0_21, %c0_22], %36 {strides = array<i32>} : memref<1x8x32xf32, #tpu.memory_space<vmem>>, vector<1x8x32xf32>,
    return
  }
  func.func @transform_0(%arg0: i32) -> (i32, i32, i32) {
    %c0_i32 = arith.constant 0 : i32
    %c0_i32_0 = arith.constant 0 : i32
    %c0_i32_1 = arith.constant 0 : i32
    return %arg0, %c0_i32, %c0_i32_0 : i32, i32, i32
  }
  func.func @transform_1(%arg0: i32) -> (i32, i32) {
    %c0_i32 = arith.constant 0 : i32
    %c0_i32_0 = arith.constant 0 : i32
    %c0_i32_1 = arith.constant 0 : i32
    return %c0_i32, %c0_i32_0 : i32, i32
  }
  func.func @transform_2(%arg0: i32) -> (i32, i32) {
    %c0_i32 = arith.constant 0 : i32
    %c0_i32_0 = arith.constant 0 : i32
    %c0_i32_1 = arith.constant 0 : i32
    return %c0_i32, %c0_i32_0 : i32, i32
  }
  func.func @transform_3(%arg0: i32) -> (i32, i32) {
    %c0_i32 = arith.constant 0 : i32
    %c0_i32_0 = arith.constant 0 : i32
    %c0_i32_1 = arith.constant 0 : i32
    return %c0_i32, %c0_i32_0 : i32, i32
  }
  func.func @transform_4(%arg0: i32) -> (i32, i32) {
    %c0_i32 = arith.constant 0 : i32
    %c0_i32_0 = arith.constant 0 : i32
    %c0_i32_1 = arith.constant 0 : i32
    return %c0_i32, %c0_i32_0 : i32, i32
  }
  func.func @transform_5(%arg0: i32) -> (i32, i32, i32) {
    %c0_i32 = arith.constant 0 : i32
    %c0_i32_0 = arith.constant 0 : i32
    %c0_i32_1 = arith.constant 0 : i32
    return %arg0, %c0_i32, %c0_i32_0 : i32, i32, i32
  }
  func.func @transform_6(%arg0: i32) -> (i32, i32, i32) {
    %c0_i32 = arith.constant 0 : i32
    %c0_i32_0 = arith.constant 0 : i32
    %c0_i32_1 = arith.constant 0 : i32
    return %arg0, %c0_i32, %c0_i32_0 : i32, i32, i32
  }
}

</mosaic_0001>

<bundles_post_ra>
// kernel: tpu_custom_call.1
= control target key start
LH: loop header
LB: loop body
LE: loop exit
PB: predicated region body
PF: predicated region fallthrough
CT: control target
= control target key end

     0   :  { %12 = vsyncpa [#allocation3], 0  ;;  %s2357_s0 = inlined_call_operand.hbm [shape: f32[16,16,32], index: 0, kind: input, shape index: {}]   ;;  %s2358_s1 = inlined_call_operand.hbm [shape: f32[32,32], index: 1, kind: input, shape index: {}]   ;;  %s2359_s2 = inlined_call_operand.vmem [shape: f32[1,32], index: 2, kind: input, shape index: {}]   ;;  %s2360_s3 = inlined_call_operand.hbm [shape: f32[32,32], index: 3, kind: input, shape index: {}]   ;;  %s2361_s4 = inlined_call_operand.vmem [shape: f32[1,32], index: 4, kind: input, shape index: {}]   ;;  %s2362_s5 = inlined_call_operand.hbm [shape: f32[2,8,32], index: 5, kind: output, shape index: {0}]   ;;  %s2363_s6 = inlined_call_operand.hbm [shape: f32[2,8,16], index: 6, kind: output, shape index: {1}]  }
   0x1   :  { %14 = vsyncpa [#allocation3 + $0x1], 0 }
   0x2   :  { %15 = vsyncpa [#allocation6], 0 }
   0x3   :  { %16 = vsyncpa [#allocation4], 0 }
   0x4   :  { %18 = vsyncpa [#allocation4 + $0x1], 0 }
   0x5   :  { %19 = vsyncpa [#allocation10], 0 }
   0x6   :  { %21 = vsyncpa [#allocation10 + $0x1], 0  ;;  %s1836_s21 = smov 0   ;;  %s1838_s22 = smov 0  }
   0x7   :  { %s1840_s23 = smov 0   ;;  %s1842_s24 = smov 0  }
   0x8 LB: > { %s1857_s25 = sadd.s32 4294967295, %s1789_s24   ;;  %s1336_s26 = sadd.s32 4294967294, %s1789_s24   ;;  %s1789_s24 = sphi %s1842_s24, %s2388_s24   ;;  %s1785_s23 = sphi %s1840_s23, %s2387_s23   ;;  %s1781_s22 = sphi %s1838_s22, %s2386_s22   ;;  %s1777_s21 = sphi %s1836_s21, %s2385_s21  }
   0x9   : > { %p47_p0 = scmp.ne.s32.totalorder %s1781_s22, %s1777_s21  ;;  %p2364_p1 = scmp.eq.s32.totalorder %s1857_s25, 0 }
   0xa   : > { %p155_p2 = scmp.eq.s32.totalorder %s1857_s25, 1  ;;  %p161_p3 = scmp.eq.s32.totalorder %s1336_s26, 1 }
   0xb   : > { %p1866_p4 = por %p2364_p1, %p47_p0  ;;  %p1337_p5 = scmp.ge.s32.totalorder %s1789_s24, 1 }
   0xc   : > { %p1871_p6 = por %p161_p3, %p47_p0  ;;  %p194_p7 = scmp.lt.s32.totalorder %s1789_s24, 3 }
   0xd   : > { %s2370_s27 = scalar_select %p1866_p4, 1, 0 }
   0xe   : > { %s2371_s28 = scalar_select %p1871_p6, 1, 0 }
   0xf   : > { %p1876_p8 = pnand %p1337_p5, %p194_p7  ;;  %s1791_s30 = smov [#allocation5]  }
  0x10   : > { %s206_s7 = sshll.u32 %s1791_s30, 4  ;;  %s1792_s9 = smov [#allocation7]   ;;  %s207_s7 = int_to_ptr.vmem [resolvable:$true] %s206_s7 }
  0x11   : > { %s2372_s29 = scalar_select %p1876_p8, 1, 0 }
  0x12   : > { %p1484_p9 = pneg %p1876_p8  ;;  %s222_s10 = sshll.u32 %s1792_s9, 4  ;;  %s223_s10 = int_to_ptr.vmem [resolvable:$true] %s222_s10 }
  0x13   : > { %s1622_s11 = scalar_lea.vmem %s207_s7, 512  ;;  %p1630_p5 = scmp.lt.s32.totalorder %s207_s7, %s207_s7 }
  0x14   : > { %p1885_p11 = pnand %p1484_p9, %p2364_p1  ;;  %p1623_p13 = scmp.ne.s32.totalorder %s207_s7, %s1622_s11 }
  0x15   : > { %p1631_p7 = scmp.lt.s32.totalorder %s1622_s11, %s1622_s11 }
  0x16   : > { %p1613_p12 = pneg %p1885_p11 }
  0x17   : > { %p1632_p10 = por %p1631_p7, %p1630_p5 }
  0x18   : > { %p1625_p0 = pnand %p1623_p13, %p1613_p12 }
  0x1a   : > { %p1626_p3 = pneg %p1625_p0 }
  0x1c   : > { %p1633_p9 = pnand %p1632_p10, %p1626_p3 }
  0x1e   : > { %1636 = shalt.err (!%p1633_p9)
}
  0x1f   : > { %s2365_s12 = smov 128   ;;  %s2366_s13 = smov 8  }
  0x20   : > { %1487 = dma.hbm_to_vmem [thread:$0]  (!%p1885_p11), %s2358_s1, 512, %s207_s7, [#allocation6], %s2365_s12, %s2365_s12, %s2366_s13  }
  0x21   : > { %s1648_s16 = scalar_lea.vmem %s223_s10, 512  ;;  %p1656_p10 = scmp.lt.s32.totalorder %s223_s10, %s223_s10 }
  0x22   : > { %p1649_p13 = scmp.ne.s32.totalorder %s223_s10, %s1648_s16  ;;  %p1657_p3 = scmp.lt.s32.totalorder %s1648_s16, %s1648_s16 }
  0x24   : > { %p1651_p0 = pnand %p1649_p13, %p1613_p12  ;;  %p1658_p7 = por %p1657_p3, %p1656_p10 }
  0x26   : > { %p1652_p5 = pneg %p1651_p0 }
  0x28   : > { %p1659_p9 = pnand %p1658_p7, %p1652_p5 }
  0x2a   : > { %1662 = shalt.err (!%p1659_p9)
}
  0x2b   : > { %1490 = dma.hbm_to_vmem [thread:$0]  (!%p1885_p11), %s2360_s3, 512, %s223_s10, [#allocation6], %s2365_s12, %s2365_s12, %s2366_s13  }
  0x2c   : > { %s1914_s19 = sadd.s32 1, %s1789_s24   ;;  %s34_s20 = sadd.s32 1, %s1785_s23 }
  0x2d   : > { %s31_s26 = ssub.s32 %s1789_s24, %s1914_s19  ;;  %p41_p12 = scmp.ne.s32.totalorder %s1785_s23, %s1781_s22 }
  0x2e   : > { %p32_p13 = scmp.eq.s32.totalorder %s31_s26, 0  ;;  %p42_p0 = scmp.eq.s32.totalorder %s1789_s24, 0 }
  0x2f   : > { %p1924_p5 = por %p155_p2, %p41_p12  ;;  %p1504_p10 = scmp.lt.s32.totalorder %s1789_s24, 2 }
  0x30   : > { %s1930_s7 = scalar_select %p32_p13, %s1785_s23, %s34_s20  }
  0x31   : > { %s2374_s30 = scalar_select %p1924_p5, 1, 0 }
  0x32   : > { %p43_p3 = por %p42_p0, %p41_p12  ;;  %s239_s8 = sand.u32 1, %s1785_s23  }
  0x33   : > { %s1341_s9 = sshll.u32 %s239_s8, 7  ;;  %s1393_s10 = sshll.u32 %s1789_s24, 11 }
  0x34   : > { %s1937_s15 = scalar_lea.hbm %s2357_s0, %s1393_s10  ;;  %s243_s16 = scalar_lea.vmem [#allocation2], %s1341_s9 }
  0x35   : > { %s251_s17 = sshll.u32 %s243_s16, 4  ;;  %p1941_p2 = pnand %p1504_p10, %p43_p3  ;;  %s1939_s17 = int_to_ptr.vmem [resolvable:$true] %s251_s17 }
  0x36   : > { %s1945_s20 = scalar_lea.sflag [#allocation3], %s239_s8  ;;  %s1663_s26 = scalar_lea.hbm %s1937_s15, 2048 }
  0x37   : > { %p1664_p11 = scmp.ne.s32.totalorder %s1937_s15, %s1663_s26  ;;  %p1665_p7 = pneg %p1941_p2 }
  0x38   : > { %s1668_s9 = scalar_lea.hbm %s2357_s0, 4096  ;;  %p1669_p13 = scmp.lt.s32.totalorder %s1937_s15, %s2357_s0 }
  0x39   : > { %p1666_p9 = pnand %p1665_p7, %p1664_p11  ;;  %p1670_p0 = scmp.lt.s32.totalorder %s1668_s9, %s1663_s26 }
  0x3b   : > { %p1667_p12 = pneg %p1666_p9  ;;  %p1671_p10 = por %p1670_p0, %p1669_p13 }
  0x3d   : > { %p1672_p3 = pnand %p1671_p10, %p1667_p12 }
  0x3f   : > { %1675 = shalt.err (!%p1672_p3)
}
  0x40   : > { %s1676_s8 = scalar_lea.vmem %s1939_s17, 2048  ;;  %s1795_s12 = smov [#allocation2]  }
  0x41   : > { %p1677_p1 = scmp.ne.s32.totalorder %s1939_s17, %s1676_s8  ;;  %s1681_s13 = sshll.u32 %s1795_s12, 4  ;;  %s1682_s13 = int_to_ptr.vmem [resolvable:$false] %s1681_s13 }
  0x42   : > { %s1683_s10 = scalar_lea.vmem %s1682_s13, 4096  ;;  %p1684_p9 = scmp.lt.s32.totalorder %s1939_s17, %s1682_s13 }
  0x43   : > { %p1679_p6 = pnand %p1677_p1, %p1665_p7  ;;  %p1685_p5 = scmp.lt.s32.totalorder %s1683_s10, %s1676_s8 }
  0x45   : > { %p1680_p11 = pneg %p1679_p6  ;;  %p1686_p4 = por %p1685_p5, %p1684_p9 }
  0x47   : > { %p1687_p8 = pnand %p1686_p4, %p1680_p11 }
  0x49   : > { %1690 = shalt.err (!%p1687_p8)
}
  0x4a   : > { %s2376_s26 = smov 8   ;;  %s2377_s11 = smov 128  }
  0x4b   : > { %1494 = dma.hbm_to_vmem [thread:$0]  (!%p1941_p2), %s1937_s15, 2048, %s1939_s17, %s1945_s20, %s2377_s11, %s2377_s11, %s2376_s26  }
  0x4c   : > { %p2378_p1 = scmp.ne.s32.totalorder %s2372_s29, 0 }
  0x4d   : > { %s1972_s12 = sand.u32 (!%p2378_p1), 1, %s1781_s22   ;;  %p2379_p4 = scmp.ne.s32.totalorder (!%p2378_p1), %s2370_s27, 0 }
  0x4e   : > { %263 = sbr.rel (%p2378_p1) target bundleno = 571 (0x23b), region = 40  ;;  %s1346_s13 = sshll.u32 (!%p2378_p1), %s1972_s12, 7 }
  0x4f   : > { %s266_s9 = scalar_lea.sflag (!%p2378_p1), [#allocation3], %s1972_s12  ;;  %s1976_s14 = scalar_lea.vmem (!%p2378_p1), [#allocation2], %s1346_s13 }
  0x53   : > { %1760 = dma.done.wait (%p2379_p4), %s266_s9, 2048  }
  0x54   : > { %1762 = vsyncadd (%p2379_p4), %s266_s9, 4294965248  ;;  %p2380_p6 = scmp.eq.s32.totalorder %s1857_s25, 0 }
  0x56   : > { %1764 = dma.done.wait (%p2380_p6), [#allocation6], 1024   ;;  %p2381_p8 = pmov %p2380_p6 }
  0x57   : > { %v1796_v0 = vmov 0.0   ;;  %vm1797_vm0 = vmmov 0   ;;  %v1986_v1 = vld [vmem:[#allocation7 + $0x18] sm:$0xff]  ;;  %v1988_v2 = vld [vmem:[#allocation7 + $0x10] sm:$0xff]  ;;  %v1991_v3 = vld [vmem:[#allocation7 + $0x8] sm:$0xff]  ;;  %vm328_vm1 = vcmask 261120  }
  0x58   : > { %1766 = vsyncadd (%p2381_p8), [#allocation6], 4294966272  ;;  %1419 = vmatprep.subr.mxu0 %v1796_v0  ;;  %1427 = vmatprep.mubr.msk.f32.mxu0 %vm1797_vm0, %v1796_v0  ;;  %v412_v4 = vld [vmem:[#allocation5 + $0x18] sm:$0xff]  ;;  %v1994_v5 = vld [vmem:[%s1976_s14 + $0x30] sm:$0xff]  ;;  %vm428_vm2 = vcmask 1041409   ;;  %vm430_vm3 = vcmask 1042434  }
  0x59   : > { %1462 = vmatprep.subr.mxu1 %v1986_v1  ;;  %1420 = vmatpush3.msra.mxu0 %v412_v4  ;;  %v1997_v6 = vld [vmem:[#allocation7] sm:$0xff]  ;;  %v356_v7 = vsel %vm328_vm1, %v1994_v5, 0.0  ;;  %v411_v8 = vld [vmem:[#allocation5 + $0x10] sm:$0xff]  ;;  %v2002_v9 = vld [vmem:[%s1976_s14 + $0x38] sm:$0xff]  ;;  %vm432_vm4 = vcmask 1043459   ;;  %vm434_vm5 = vcmask 1044484  }
  0x5a   : > { %1466 = vmatpush3.msra.mxu1 %v1986_v1  ;;  %1421 = vmatprep.subr.mxu0 %v1796_v0  ;;  %v357_v10 = vsel %vm328_vm1, %v2002_v9, 0.0  ;;  %v410_v11 = vld [vmem:[#allocation5 + $0x8] sm:$0xff]  ;;  %v2008_v12 = vld [vmem:[%s1976_s14 + $0x40] sm:$0xff]  ;;  %v2027_v20 = vld [vmem:[%s1976_s14 + $0x10] sm:$0xff]  ;;  %vm436_vm6 = vcmask 1045509   ;;  %vm438_vm7 = vcmask 1046534  }
  0x5b   : > { %1463 = vmatprep.subr.mxu1 %v1988_v2  ;;  %v2011_v13 = vld [vmem:[%s1976_s14 + $0x48] sm:$0xff]  ;;  %1447 = vmatprep.mubr.msk.f32.mxu1 %vm328_vm1, %v1994_v5  ;;  %v358_v14 = vadd.f32 %v357_v10, %v356_v7  ;;  %v365_v15 = vsel %vm328_vm1, %v2008_v12, 0.0  ;;  %v409_v16 = vld [vmem:[#allocation5] sm:$0xff]  ;;  %v2031_v22 = vld [vmem:[%s1976_s14 + $0x18] sm:$0xff]  ;;  %v338_v27 = vsel %vm328_vm1, %v2027_v20, 0.0  ;;  %vm440_vm8 = vcmask 1047559  }
  0x5c   : > { %1467 = vmatpush3.msra.mxu1 %v1988_v2  ;;  %v366_v17 = vsel %vm328_vm1, %v2011_v13, 0.0  ;;  %v2021_v18 = vld [vmem:[%s1976_s14] sm:$0xff]  ;;  %v2024_v19 = vld [vmem:[%s1976_s14 + $0x8] sm:$0xff]  ;;  %1422 = vmatpush3.msra.mxu0 %v411_v8  ;;  %v2047_v29 = vld [vmem:[%s1976_s14 + $0x50] sm:$0xff]  ;;  %v339_v33 = vsel %vm328_vm1, %v2031_v22, 0.0  ;;  %vm995_vm9 = vcmask 130112  }
  0x5d   : > { %1464 = vmatprep.subr.mxu1 %v1991_v3  ;;  %v367_v21 = vadd.f32 %v366_v17, %v365_v15  ;;  %v2034_v23 = vld [vmem:[%s1976_s14 + $0x20] sm:$0xff]  ;;  %v2037_v24 = vld [vmem:[%s1976_s14 + $0x28] sm:$0xff]  ;;  %v329_v25 = vsel %vm328_vm1, %v2021_v18, 0.0  ;;  %v330_v26 = vsel %vm328_vm1, %v2024_v19, 0.0  ;;  %v359_v28 = vrot.slane %v358_v14, 4  ;;  %1423 = vmatprep.subr.mxu0 %v1796_v0  ;;  %v2050_v30 = vld [vmem:[%s1976_s14 + $0x58] sm:$0xff] }
  0x5e   : > { %1468 = vmatpush3.msra.mxu1 %v1991_v3  ;;  %v2053_v31 = vld [vmem:[%s1976_s14 + $0x60] sm:$0xff]  ;;  %v331_v32 = vadd.f32 %v330_v26, %v329_v25  ;;  %v347_v34 = vsel %vm328_vm1, %v2034_v23, 0.0  ;;  %1424 = vmatpush3.msra.mxu0 %v410_v11  ;;  %v2061_v36 = vld [vmem:[%s1976_s14 + $0x68] sm:$0xff]  ;;  %v340_v37 = vadd.f32 %v339_v33, %v338_v27  ;;  %v348_v38 = vsel %vm328_vm1, %v2037_v24, 0.0  ;;  %v2073_v45 = vld [vmem:[%s1976_s14 + $0x70] sm:$0xff]  ;;  %s1349_s18 = sshll.u32 %s1972_s12, 3 }
  0x5f   : > { %1465 = vmatprep.subr.mxu1 %v1997_v6  ;;  %v368_v35 = vrot.slane %v367_v21, 4  ;;  %v374_v39 = vsel %vm328_vm1, %v2047_v29, 0.0  ;;  %v360_v40 = vadd.f32 %v359_v28, %v358_v14  ;;  %1425 = vmatprep.subr.mxu0 %v1796_v0  ;;  %v349_v42 = vadd.f32 %v348_v38, %v347_v34  ;;  %v2083_v54 = vld [vmem:[%s1976_s14 + $0x78] sm:$0xff]  ;;  %s1388_s20 = sshll.u32 %s1857_s25, 7  ;;  %s310_s16 = scalar_lea.vmem [#allocation9], %s1349_s18 }
  0x60   : > { %1469 = vmatpush3.msra.mxu1 %v1997_v6  ;;  %v332_v41 = vrot.slane %v331_v32, 4  ;;  %v375_v43 = vsel %vm328_vm1, %v2050_v30, 0.0  ;;  %1426 = vmatpush3.msra.mxu0 %v409_v16  ;;  %v341_v46 = vrot.slane %v340_v37, 4  ;;  %v383_v48 = vsel %vm328_vm1, %v2053_v31, 0.0  ;;  %s1215_s8 = sshll.u32 %s310_s16, 4  ;;  %s2277_s11 = scalar_lea.hbm %s2363_s6, %s1388_s20  ;;  %s2279_s8 = int_to_ptr.vmem [resolvable:$true] %s1215_s8 }
  0x61   : > { %1448 = vmatmul.mubr.msk.f32.vlgmr.msra.gmra.mxu1 %vm328_vm1, %v2002_v9  ;;  %v369_v44 = vadd.f32 %v368_v35, %v367_v21  ;;  %v376_v47 = vadd.f32 %v375_v43, %v374_v39  ;;  %v361_v49 = vrot.slane %v360_v40, 2  ;;  %1430 = vmatprep.subr.mxu0 %v1986_v1  ;;  %v350_v51 = vrot.slane %v349_v42, 4  ;;  %s1189_s13 = scalar_lea.sflag [#allocation10], %s1972_s12  ;;  %s1691_s9 = scalar_lea.vmem %s2279_s8, 128 }
  0x62   : > { %1450 = vmatprep.mubr.msk.f32.mxu1 %vm328_vm1, %v2008_v12  ;;  %v333_v50 = vadd.f32 %v332_v41, %v331_v32  ;;  %v384_v52 = vsel %vm328_vm1, %v2061_v36, 0.0  ;;  %v342_v55 = vadd.f32 %v341_v46, %v340_v37  ;;  %v392_v61 = vsel %vm328_vm1, %v2073_v45, 0.0  ;;  %p1692_p5 = scmp.ne.s32.totalorder %s2279_s8, %s1691_s9  ;;  %p2382_p2 = scmp.ne.s32.totalorder %s2374_s30, 0 }
  0x63   : > { %v370_v53 = vrot.slane %v369_v44, 2  ;;  %v377_v56 = vrot.slane %v376_v47, 4  ;;  %v385_v57 = vadd.f32 %v384_v52, %v383_v48  ;;  %v362_v58 = vadd.f32 %v361_v49, %v360_v40  ;;  %s1799_s14 = smov [#allocation9]  }
  0x64   : > { %v334_v59 = vrot.slane %v333_v50, 2  ;;  %v351_v60 = vadd.f32 %v350_v51, %v349_v42  ;;  %v343_v63 = vrot.slane %v342_v55, 2  ;;  %v393_v11 = vsel %vm328_vm1, %v2083_v54, 0.0  ;;  %p1693_p7 = pnand %p1692_p5, %p2382_p2  ;;  %s1695_s27 = sshll.u32 %s1799_s14, 4  ;;  %s1696_s27 = int_to_ptr.vmem [resolvable:$false] %s1695_s27 }
  0x65   : > { %v371_v62 = vadd.f32 %v370_v53, %v369_v44  ;;  %1451 = vmatmul.mubr.msk.f32.gmra.mxu1 %vm328_vm1, %v2011_v13  ;;  %v378_v0 = vadd.f32 %v377_v56, %v376_v47  ;;  %v386_v4 = vrot.slane %v385_v57, 4  ;;  %v363_v7 = vrot.slane %v362_v58, 1  ;;  %s1697_s29 = scalar_lea.vmem %s1696_s27, 256  ;;  %p1698_p13 = scmp.lt.s32.totalorder %s2279_s8, %s1696_s27 }
  0x66   : > { %v335_v8 = vadd.f32 %v334_v59, %v333_v50  ;;  %v352_v10 = vrot.slane %v351_v60, 2  ;;  %1453 = vmatprep.mubr.msk.f32.mxu1 %vm328_vm1, %v2047_v29  ;;  %v344_v15 = vadd.f32 %v343_v63, %v342_v55  ;;  %v394_v26 = vadd.f32 %v393_v11, %v392_v61  ;;  %p1694_p12 = pneg %p1693_p7  ;;  %p1699_p0 = scmp.lt.s32.totalorder %s1697_s29, %s1691_s9 }
  0x67   : > { %v372_v14 = vrot.slane %v371_v62, 1  ;;  %v379_v16 = vrot.slane %v378_v0, 2  ;;  %v387_v17 = vadd.f32 %v386_v4, %v385_v57  ;;  %v364_v27 = vadd.f32 %v363_v7, %v362_v58 }
  0x68   : > { %v336_v21 = vrot.slane %v335_v8, 1  ;;  %v353_v25 = vadd.f32 %v352_v10, %v351_v60  ;;  %v345_v28 = vrot.slane %v344_v15, 1  ;;  %v395_v38 = vrot.slane %v394_v26, 4  ;;  %p1700_p10 = por %p1699_p0, %p1698_p13 }
  0x69   : > { %v380_v32 = vadd.f32 %v379_v16, %v378_v0  ;;  %v388_v33 = vrot.slane %v387_v17, 2  ;;  %1454 = vmatmul.mubr.msk.f32.gmra.mxu1 %vm328_vm1, %v2050_v30  ;;  %v373_v34 = vadd.f32 %v372_v14, %v371_v62  ;;  %v404_v46 = vmul.f32 0.0625, %v364_v27 }
  0x6a   : > { %v337_v35 = vadd.f32 %v336_v21, %v335_v8  ;;  %v354_v37 = vrot.slane %v353_v25, 1  ;;  %1456 = vmatprep.mubr.msk.f32.mxu1 %vm328_vm1, %v2053_v31  ;;  %v346_v39 = vadd.f32 %v345_v28, %v344_v15  ;;  %v396_v43 = vadd.f32 %v395_v38, %v394_v26  ;;  %v2142_v38 = vld [vmem:[%s2361_s4] ss:$0 sm:$0xff]  ;;  %p1701_p3 = pnand %p1700_p10, %p1694_p12 }
  0x6b   : > { %v381_v40 = vrot.slane %v380_v32, 1  ;;  %v389_v41 = vadd.f32 %v388_v33, %v387_v17  ;;  %v405_v50 = vmul.f32 0.0625, %v373_v34  ;;  %v1798_v14 = vmov 1966171168  }
  0x6c   : > { %v355_v42 = vadd.f32 %v354_v37, %v353_v25  ;;  %v401_v44 = vmul.f32 0.0625, %v337_v35  ;;  %v402_v49 = vmul.f32 0.0625, %v346_v39  ;;  %v397_v51 = vrot.slane %v396_v43, 2  ;;  %v1351_v25 = vld [vmem:[%s2359_s2] ss:$0 sm:$0xff] }
  0x6d   : > { %v382_v47 = vadd.f32 %v381_v40, %v380_v32  ;;  %v390_v48 = vrot.slane %v389_v41, 1  ;;  %1457 = vmatmul.mubr.msk.f32.gmra.mxu1 %vm328_vm1, %v2061_v36  ;;  %v721_v15 = vunpack.c.l.s4 %v1798_v14  ;;  %vm1068_vm10 = vcmask 130048  }
  0x6e   : > { %v403_v52 = vmul.f32 0.0625, %v355_v42  ;;  %1459 = vmatprep.mubr.msk.f32.mxu1 %vm328_vm1, %v2073_v45  ;;  %v429_v56 = vsel %vm428_vm2, %v402_v49, %v401_v44  ;;  %v398_v57 = vadd.f32 %v397_v51, %v396_v43 }
  0x6f   : > { %v391_v53 = vadd.f32 %v390_v48, %v389_v41  ;;  %v406_v55 = vmul.f32 0.0625, %v382_v47  ;;  %v722_v17 = vunpack.c.0.s8 %v721_v15 }
  0x70   : > { %v431_v58 = vsel %vm430_vm3, %v403_v52, %v429_v56  ;;  %v399_v61 = vrot.slane %v398_v57, 1 }
  0x71   : > { %v407_v59 = vmul.f32 0.0625, %v391_v53  ;;  %v433_v60 = vsel %vm432_vm4, %v404_v46, %v431_v58  ;;  %1460 = vmatmul.mubr.msk.f32.gmra.mxu1 %vm328_vm1, %v2083_v54 }
  0x72   : > { %v435_v62 = vsel %vm434_vm5, %v405_v50, %v433_v60  ;;  %v400_v0 = vadd.f32 %v399_v61, %v398_v57 }
  0x73   : > { %v437_v63 = vsel %vm436_vm6, %v406_v55, %v435_v62 }
  0x74   : > { %v439_v4 = vsel %vm438_vm7, %v407_v59, %v437_v63  ;;  %v408_v7 = vmul.f32 0.0625, %v400_v0 }
  0x76   : > { %v441_v8 = vsel %vm440_vm8, %v408_v7, %v439_v4 }
  0x77   : > { %1428 = vmatmul.mubr.msk.f32.vlgmr.msra.gmra.mxu0 %vm328_vm1, %v441_v8 }
  0x78   : > { %1431 = vmatpush3.msra.mxu0 %v1986_v1  ;;  %1438 = vmatprep.mubr.msk.f32.mxu0 %vm328_vm1, %v2021_v18  ;;  %v723_v1 = vlaneseq }
  0x79   : > { %1432 = vmatprep.subr.mxu0 %v1988_v2 }
  0x7a   : > { %1433 = vmatpush3.msra.mxu0 %v1988_v2  ;;  %v724_v2 = vshrl.u32 %v723_v1, 7 }
  0x7b   : > { %1434 = vmatprep.subr.mxu0 %v1991_v3 }
  0x7c   : > { %1435 = vmatpush3.msra.mxu0 %v1991_v3  ;;  %v985_v3 = vand.u32 127, %v723_v1  ;;  %v725_v26 = vsub.s32 %v722_v17, %v724_v2  ;;  %v2137_v37 = vsub.s32 0, %v724_v2 }
  0x7d   : > { %1436 = vmatprep.subr.mxu0 %v1997_v6 }
  0x7e   : > { %1437 = vmatpush3.msra.mxu0 %v1997_v6  ;;  %v2130_v10 = vsub.s32 %v985_v3, %v724_v2  ;;  %v990_v6 = vadd.s32 4294967288, %v985_v3 }
  0x7f   : > { %1439 = vmatmul.mubr.msk.f32.vlgmr.msra.gmra.mxu0 %vm328_vm1, %v2024_v19 }
  0x80   : > { %1441 = vmatprep.mubr.msk.f32.mxu0 %vm328_vm1, %v2027_v20  ;;  %v2132_v11 = vsub.s32 %v990_v6, %v724_v2 }
  0x83   : > { %1442 = vmatmul.mubr.msk.f32.gmra.mxu0 %vm328_vm1, %v2031_v22 }
  0x84   : > { %1444 = vmatprep.mubr.msk.f32.mxu0 %vm328_vm1, %v2034_v23 }
  0x87   : > { %1445 = vmatmul.mubr.msk.f32.gmra.mxu0 %vm328_vm1, %v2037_v24 }
 0x121   : > { %v1449_v16 = vpop.f32.mrf.mxu1 }
 0x122   : > { %v675_v60 = vadd.f32 %v1449_v16, %v2142_v38 }
 0x123   : > { %v669_v21 = vpop.f32.mrf.mxu1 }
 0x125   : > { %v1452_v28 = vpop.f32.mrf.mxu1 }
 0x126   : > { %v685_v43 = vadd.f32 %v1452_v28, %v2142_v38  ;;  %v670_v28 = vadd.f32 %v2142_v38, %v669_v21 }
 0x127   : > { %v679_v42 = vpop.f32.mrf.mxu1 }
 0x128   : > { %v680_v49 = vadd.f32 %v2142_v38, %v679_v42 }
 0x129   : > { %v1455_v51 = vpop.f32.mrf.mxu1 }
 0x12a   : > { %v695_v61 = vadd.f32 %v1455_v51, %v2142_v38 }
 0x12b   : > { %v689_v4 = vpop.f32.mrf.mxu1 }
 0x12d   : > { %v1458_v15 = vpop.f32.mrf.mxu1 }
 0x137   : > { %v510_v27 = vpop.f32.mrf.mxu0 }
 0x138   : > { %v511_v32 = vadd.f32 %v1351_v25, %v510_v27 }
 0x139   : > { %v1429_v33 = vpop.f32.mrf.mxu0 }
 0x13a   : > { %v719_v34 = vcombine.high %v511_v32, %v511_v32  ;;  %v726_v35 = vrot.slane %v511_v32, %v725_v26  ;;  %v690_v33 = vadd.f32 %v2142_v38, %v689_v4 }
 0x13c   : > { %v733_v39 = vrot.slane %v719_v34, %v725_v26  ;;  %v734_v40 = vcombine.high %v726_v35, %v726_v35  ;;  %v2144_v41 = vrot.slane %v726_v35, %v725_v26  ;;  %v699_v35 = vpop.f32.mrf.mxu1 }
 0x13e   : > { %v735_v44 = vcombine.high %v733_v39, %v733_v39  ;;  %v756_v46 = vrot.slane %v734_v40, %v725_v26  ;;  %v771_v47 = vrot.slane %v2144_v41, %v2137_v37  ;;  %v749_v48 = vrot.slane %v733_v39, %v725_v26 }
 0x13f   : > { %v1440_v50 = vpop.f32.mrf.mxu0 }
 0x140   : > { %v645_v52 = vadd.f32 %v1440_v50, %v2142_v38  ;;  %v787_v53 = vrot.slane %v749_v48, %v2137_v37  ;;  %v766_v55 = vcombine.high %v756_v46, %v756_v46  ;;  %v2152_v56 = vrot.slane %v735_v44, %v725_v26  ;;  %v1461_v50 = vpop.f32.mrf.mxu1 }
 0x141   : > { %v639_v57 = vpop.f32.mrf.mxu0  ;;  %v775_v32 = vrot.slane %v756_v46, %v2137_v37  ;;  %v715_v4 = vadd.f32 %v1461_v50, %v2142_v38 }
 0x142   : > { %v809_v58 = vmul.f32 %v771_v47, %v645_v52  ;;  %v817_v59 = vmul.f32 %v787_v53, %v685_v43  ;;  %v640_v62 = vadd.f32 %v2142_v38, %v639_v57  ;;  %v783_v0 = vrot.slane %v766_v55, %v2137_v37 }
 0x143   : > { %v1443_v63 = vpop.f32.mrf.mxu0  ;;  %v816_v1 = vmul.f32 %v787_v53, %v680_v49  ;;  %v791_v2 = vrot.slane %v2152_v56, %v2137_v37  ;;  %v765_v49 = vcombine.high %v749_v48, %v749_v48  ;;  %v767_v48 = vcombine.high %v2152_v56, %v2152_v56 }
 0x144   : > { %v827_v7 = vsel %vm328_vm1, %v809_v58, 0.0  ;;  %v851_v8 = vsel %vm328_vm1, %v817_v59, 0.0  ;;  %v815_v6 = vmul.f32 %v783_v0, %v675_v60  ;;  %v655_v14 = vadd.f32 %v1443_v63, %v2142_v38  ;;  %v709_v60 = vpop.f32.mrf.mxu1 }
 0x145   : > { %828 = vadd.xlane.f32.xlu0 %v827_v7  ;;  %v649_v3 = vpop.f32.mrf.mxu0  ;;  %852 = vadd.xlane.f32.xlu1 %v851_v8  ;;  %v848_v16 = vsel %vm328_vm1, %v816_v1, 0.0  ;;  %v808_v25 = vmul.f32 %v771_v47, %v640_v62  ;;  %v819_v26 = vmul.f32 %v791_v2, %v695_v61  ;;  %v814_v42 = vmul.f32 %v783_v0, %v670_v28 }
 0x146   : > { %v845_v17 = vsel %vm328_vm1, %v815_v6, 0.0  ;;  %v650_v34 = vadd.f32 %v2142_v38, %v649_v3  ;;  %v811_v43 = vmul.f32 %v775_v32, %v655_v14  ;;  %v764_v47 = vcombine.high %v2144_v41, %v2144_v41 }
 0x147   : > { %v1446_v27 = vpop.f32.mrf.mxu0  ;;  %v824_v39 = vsel %vm328_vm1, %v808_v25, 0.0  ;;  %v857_v40 = vsel %vm328_vm1, %v819_v26, 0.0  ;;  %v818_v46 = vmul.f32 %v791_v2, %v690_v33  ;;  %v842_v52 = vsel %vm328_vm1, %v814_v42, 0.0 }
 0x148   : > { %v665_v21 = vadd.f32 %v1446_v27, %v2142_v38  ;;  %v833_v53 = vsel %vm328_vm1, %v811_v43, 0.0  ;;  %v810_v55 = vmul.f32 %v775_v32, %v650_v34  ;;  %v779_v57 = vrot.slane %v764_v47, %v2137_v37 }
 0x149   : > { %849 = vadd.xlane.f32.xlu0 %v848_v16  ;;  %846 = vadd.xlane.f32.xlu1 %v845_v17  ;;  %v659_v44 = vpop.f32.mrf.mxu0  ;;  %v705_v58 = vadd.f32 %v1458_v15, %v2142_v38  ;;  %v700_v41 = vadd.f32 %v2142_v38, %v699_v35  ;;  %v795_v59 = vrot.slane %v765_v49, %v2137_v37  ;;  %v854_v61 = vsel %vm328_vm1, %v818_v46, 0.0 }
 0x14a   : > { %v660_v51 = vadd.f32 %v2142_v38, %v659_v44  ;;  %v830_v62 = vsel %vm328_vm1, %v810_v55, 0.0  ;;  %v813_v0 = vmul.f32 %v779_v57, %v665_v21  ;;  %v710_v7 = vadd.f32 %v2142_v38, %v709_v60 }
 0x14b   : > { %v820_v8 = vmul.f32 %v795_v59, %v700_v41  ;;  %v821_v3 = vmul.f32 %v795_v59, %v705_v58  ;;  %v799_v56 = vrot.slane %v767_v48, %v2137_v37 }
 0x14c   : > { %v812_v63 = vmul.f32 %v779_v57, %v660_v51  ;;  %v839_v2 = vsel %vm328_vm1, %v813_v0, 0.0 }
 0x14d   : > { %825 = vadd.xlane.f32.xlu0 %v824_v39  ;;  %858 = vadd.xlane.f32.xlu1 %v857_v40  ;;  %v860_v6 = vsel %vm328_vm1, %v820_v8, 0.0  ;;  %v863_v14 = vsel %vm328_vm1, %v821_v3, 0.0  ;;  %v822_v15 = vmul.f32 %v799_v56, %v710_v7  ;;  %v823_v16 = vmul.f32 %v799_v56, %v715_v4 }
 0x14e   : > { %v836_v1 = vsel %vm328_vm1, %v812_v63, 0.0 }
 0x14f   : > { %v866_v38 = vsel %vm328_vm1, %v822_v15, 0.0  ;;  %v869_v17 = vsel %vm328_vm1, %v823_v16, 0.0 }
 0x151   : > { %843 = vadd.xlane.f32.xlu0 %v842_v52  ;;  %834 = vadd.xlane.f32.xlu1 %v833_v53 }
 0x155   : > { %855 = vadd.xlane.f32.xlu0 %v854_v61  ;;  %831 = vadd.xlane.f32.xlu1 %v830_v62 }
 0x159   : > { %837 = vadd.xlane.f32.xlu0 %v836_v1  ;;  %840 = vadd.xlane.f32.xlu1 %v839_v2 }
 0x15d   : > { %861 = vadd.xlane.f32.xlu0 %v860_v6  ;;  %864 = vadd.xlane.f32.xlu1 %v863_v14 }
 0x161   : > { %867 = vadd.xlane.f32.xlu0 %v866_v38  ;;  %870 = vadd.xlane.f32.xlu1 %v869_v17 }
 0x1ce   : > { %v829_v25 = vpop.xlane.xlu0 %828  ;;  %v853_v26 = vpop.xlane.xlu1 %852 }
 0x1cf   : > { %v1371_v27 = vmul.f32 -1.442695, %v829_v25  ;;  %v1379_v37 = vmul.f32 -1.442695, %v853_v26 }
 0x1d1   : > { %1547 = vpow2.f32 %v1371_v27 }
 0x1d2   : > { %1549 = vpow2.f32 %v1379_v37  ;;  %v850_v28 = vpop.xlane.xlu0 %849  ;;  %v847_v32 = vpop.xlane.xlu1 %846 }
 0x1d3   : > { %v1378_v33 = vmul.f32 -1.442695, %v850_v28  ;;  %v1377_v34 = vmul.f32 -1.442695, %v847_v32 }
 0x1d5   : > { %1551 = vpow2.f32 %v1378_v33 }
 0x1d6   : > { %1553 = vpow2.f32 %v1377_v34  ;;  %v826_v35 = vpop.xlane.xlu0 %825  ;;  %v859_v39 = vpop.xlane.xlu1 %858 }
 0x1d7   : > { %v1370_v40 = vmul.f32 -1.442695, %v826_v35  ;;  %v1381_v42 = vmul.f32 -1.442695, %v859_v39 }
 0x1d9   : > { %1555 = vpow2.f32 %v1370_v40 }
 0x1da   : > { %1557 = vpow2.f32 %v1381_v42  ;;  %v844_v43 = vpop.xlane.xlu0 %843  ;;  %v835_v44 = vpop.xlane.xlu1 %834 }
 0x1db   : > { %v1376_v47 = vmul.f32 -1.442695, %v844_v43  ;;  %v1373_v21 = vmul.f32 -1.442695, %v835_v44 }
 0x1dd   : > { %1559 = vpow2.f32 %v1376_v47 }
 0x1de   : > { %v1548_v46 = vpop.eup %1547  ;;  %1561 = vpow2.f32 %v1373_v21  ;;  %v856_v49 = vpop.xlane.xlu0 %855 }
 0x1df   : > { %v832_v50 = vpop.xlane.xlu1 %831  ;;  %v1550_v51 = vpop.eup %1549  ;;  %v921_v52 = vadd.f32 1.0, %v1548_v46  ;;  %v1380_v53 = vmul.f32 -1.442695, %v856_v49 }
 0x1e0   : > { %v929_v55 = vadd.f32 1.0, %v1550_v51  ;;  %v1372_v57 = vmul.f32 -1.442695, %v832_v50 }
 0x1e1   : > { %1563 = vrcp.f32 %v921_v52 }
 0x1e2   : > { %v1552_v58 = vpop.eup %1551  ;;  %1565 = vrcp.f32 %v929_v55  ;;  %v838_v41 = vpop.xlane.xlu0 %837 }
 0x1e3   : > { %v841_v59 = vpop.xlane.xlu1 %840  ;;  %v1554_v48 = vpop.eup %1553  ;;  %v928_v60 = vadd.f32 1.0, %v1552_v58  ;;  %1567 = vpow2.f32 %v1380_v53  ;;  %v1374_v61 = vmul.f32 -1.442695, %v838_v41 }
 0x1e4   : > { %v927_v62 = vadd.f32 1.0, %v1554_v48  ;;  %1569 = vpow2.f32 %v1372_v57  ;;  %v1375_v63 = vmul.f32 -1.442695, %v841_v59 }
 0x1e5   : > { %1571 = vrcp.f32 %v928_v60 }
 0x1e6   : > { %v1556_v0 = vpop.eup %1555  ;;  %1573 = vrcp.f32 %v927_v62  ;;  %v862_v4 = vpop.xlane.xlu0 %861 }
 0x1e7   : > { %v865_v7 = vpop.xlane.xlu1 %864  ;;  %v1558_v8 = vpop.eup %1557  ;;  %v920_v1 = vadd.f32 1.0, %v1556_v0  ;;  %1575 = vpow2.f32 %v1374_v61  ;;  %v1382_v2 = vmul.f32 -1.442695, %v862_v4 }
 0x1e8   : > { %v931_v3 = vadd.f32 1.0, %v1558_v8  ;;  %1577 = vpow2.f32 %v1375_v63  ;;  %v1383_v56 = vmul.f32 -1.442695, %v865_v7 }
 0x1e9   : > { %1579 = vrcp.f32 %v920_v1 }
 0x1ea   : > { %v1560_v6 = vpop.eup %1559  ;;  %1581 = vrcp.f32 %v931_v3  ;;  %v868_v14 = vpop.xlane.xlu0 %867 }
 0x1eb   : > { %v871_v15 = vpop.xlane.xlu1 %870  ;;  %v1562_v16 = vpop.eup %1561  ;;  %v926_v38 = vadd.f32 1.0, %v1560_v6  ;;  %1583 = vpow2.f32 %v1382_v2  ;;  %v1384_v17 = vmul.f32 -1.442695, %v868_v14 }
 0x1ec   : > { %v923_v25 = vadd.f32 1.0, %v1562_v16  ;;  %1585 = vpow2.f32 %v1383_v56  ;;  %v1385_v26 = vmul.f32 -1.442695, %v871_v15 }
 0x1ed   : > { %1587 = vrcp.f32 %v926_v38 }
 0x1ee   : > { %v1564_v27 = vpop.eup %1563  ;;  %1589 = vrcp.f32 %v923_v25 }
 0x1ef   : > { %v1566_v37 = vpop.eup %1565  ;;  %1591 = vpow2.f32 %v1384_v17  ;;  %v1071_v46 = vmul.f32 %v1564_v27, %v2024_v19  ;;  %v994_v52 = vrot.slane %v1564_v27, %v2132_v11 }
 0x1f0   : > { %v1568_v28 = vpop.eup %1567  ;;  %1593 = vpow2.f32 %v1385_v26  ;;  %v1079_v35 = vmul.f32 %v1566_v37, %v2011_v13  ;;  %v1031_v42 = vrot.slane %v1566_v37, %v2132_v11 }
 0x1f1   : > { %v1570_v32 = vpop.eup %1569  ;;  %v930_v33 = vadd.f32 1.0, %v1568_v28  ;;  %v1087_v60 = vsel %vm328_vm1, %v1071_v46, 0.0 }
 0x1f2   : > { %v1572_v34 = vpop.eup %1571  ;;  %v922_v39 = vadd.f32 1.0, %v1570_v32  ;;  %v1123_v53 = vsel %vm328_vm1, %v1079_v35, 0.0 }
 0x1f3   : > { %v1574_v40 = vpop.eup %1573  ;;  %v1027_v43 = vrot.slane %v1572_v34, %v2130_v10  ;;  %v1078_v44 = vmul.f32 %v1572_v34, %v2008_v12  ;;  %1595 = vrcp.f32 %v930_v33 }
 0x1f4   : > { %v1576_v47 = vpop.eup %1575  ;;  %1597 = vrcp.f32 %v922_v39  ;;  %v1077_v59 = vmul.f32 %v1574_v40, %v2002_v9  ;;  %v1022_v4 = vrot.slane %v1574_v40, %v2132_v11 }
 0x1f5   : > { %v1578_v21 = vpop.eup %1577  ;;  %v1122_v49 = vsel %vm328_vm1, %v1078_v44, 0.0  ;;  %v924_v50 = vadd.f32 1.0, %v1576_v47  ;;  %v2201_v13 = vsel %vm995_vm9, %v1031_v42, %v1027_v43 }
 0x1f6   : > { %v1580_v51 = vpop.eup %1579  ;;  %v925_v55 = vadd.f32 1.0, %v1578_v21  ;;  %v1124_v12 = vadd.f32 %v1123_v53, %v1122_v49  ;;  %v1114_v56 = vsel %vm328_vm1, %v1077_v59, 0.0 }
 0x1f7   : > { %v1582_v57 = vpop.eup %1581  ;;  %v989_v58 = vrot.slane %v1580_v51, %v2130_v10  ;;  %v1070_v41 = vmul.f32 %v1580_v51, %v2021_v18  ;;  %1599 = vrcp.f32 %v924_v50 }
 0x1f8   : > { %v1584_v19 = vpop.eup %1583  ;;  %1601 = vrcp.f32 %v925_v55  ;;  %v1125_v18 = vrot.slane %v1124_v12, 4  ;;  %v1081_v27 = vmul.f32 %v1582_v57, %v2050_v30  ;;  %v1040_v34 = vrot.slane %v1582_v57, %v2132_v11 }
 0x1f9   : > { %v1586_v48 = vpop.eup %1585  ;;  %v996_v61 = vsel %vm995_vm9, %v994_v52, %v989_v58  ;;  %v1086_v62 = vsel %vm328_vm1, %v1070_v41, 0.0  ;;  %v932_v63 = vadd.f32 1.0, %v1584_v19 }
 0x1fa   : > { %v1588_v0 = vpop.eup %1587  ;;  %v1088_v7 = vadd.f32 %v1087_v60, %v1086_v62  ;;  %v933_v8 = vadd.f32 1.0, %v1586_v48  ;;  %v1126_v26 = vadd.f32 %v1125_v18, %v1124_v12  ;;  %v1132_v43 = vsel %vm328_vm1, %v1081_v27, 0.0 }
 0x1fb   : > { %v1590_v1 = vpop.eup %1589  ;;  %v1018_v2 = vrot.slane %v1588_v0, %v2130_v10  ;;  %v1076_v9 = vmul.f32 %v1588_v0, %v1994_v5  ;;  %1603 = vrcp.f32 %v932_v63 }
 0x1fc   : > { %v1592_v3 = vpop.eup %1591  ;;  %1605 = vrcp.f32 %v933_v8  ;;  %v1089_v14 = vrot.slane %v1088_v7, 4  ;;  %v1073_v28 = vmul.f32 %v1590_v1, %v2031_v22  ;;  %v1004_v40 = vrot.slane %v1590_v1, %v2132_v11 }
 0x1fd   : > { %v1594_v6 = vpop.eup %1593  ;;  %v1113_v15 = vsel %vm328_vm1, %v1076_v9, 0.0  ;;  %v934_v16 = vadd.f32 1.0, %v1592_v3  ;;  %v2217_v38 = vsel %vm995_vm9, %v1022_v4, %v1018_v2  ;;  %v1127_v22 = vrot.slane %v1126_v26, 2 }
 0x1fe   : > { %v1115_v17 = vadd.f32 %v1114_v56, %v1113_v15  ;;  %v935_v25 = vadd.f32 1.0, %v1594_v6  ;;  %v1090_v33 = vadd.f32 %v1089_v14, %v1088_v7  ;;  %v1096_v49 = vsel %vm328_vm1, %v1073_v28, 0.0 }
 0x1ff   : > { %1607 = vrcp.f32 %v934_v16  ;;  %v2240_v59 = vadd.f32 %v1127_v22, %v1126_v26 }
 0x200   : > { %v1596_v5 = vpop.eup %1595  ;;  %v1116_v37 = vrot.slane %v1115_v17, 4  ;;  %1609 = vrcp.f32 %v935_v25  ;;  %v1091_v52 = vrot.slane %v1090_v33, 2 }
 0x201   : > { %v1598_v32 = vpop.eup %1597  ;;  %v1036_v35 = vrot.slane %v1596_v5, %v2130_v10  ;;  %v1080_v39 = vmul.f32 %v1596_v5, %v2047_v29  ;;  %v1129_v56 = vrot.slane %v2240_v59, 1 }
 0x202   : > { %v1000_v42 = vrot.slane %v1598_v32, %v2130_v10  ;;  %v1072_v30 = vmul.f32 %v1598_v32, %v2027_v20  ;;  %v1117_v46 = vadd.f32 %v1116_v37, %v1115_v17 }
 0x203   : > { %v1131_v44 = vsel %vm328_vm1, %v1080_v39, 0.0  ;;  %v2230_v47 = vsel %vm995_vm9, %v1040_v34, %v1036_v35 }
 0x204   : > { %v1600_v21 = vpop.eup %1599  ;;  %v1133_v50 = vadd.f32 %v1132_v43, %v1131_v44  ;;  %v1005_v29 = vsel %vm995_vm9, %v1004_v40, %v1000_v42  ;;  %v1095_v53 = vsel %vm328_vm1, %v1072_v30, 0.0  ;;  %v1118_v62 = vrot.slane %v1117_v46, 2 }
 0x205   : > { %v1602_v51 = vpop.eup %1601  ;;  %v1009_v20 = vrot.slane %v1600_v21, %v2130_v10  ;;  %v1074_v55 = vmul.f32 %v1600_v21, %v2034_v23  ;;  %v1097_v12 = vadd.f32 %v1096_v49, %v1095_v53  ;;  %v1060_v48 = vsel %vm428_vm2, %v1005_v29, %v996_v61 }
 0x206   : > { %v1134_v57 = vrot.slane %v1133_v50, 4  ;;  %v1013_v58 = vrot.slane %v1602_v51, %v2132_v11  ;;  %v1075_v19 = vmul.f32 %v1602_v51, %v2037_v24  ;;  %v1092_v23 = vadd.f32 %v1091_v52, %v1090_v33 }
 0x207   : > { %v1104_v41 = vsel %vm328_vm1, %v1074_v55, 0.0  ;;  %v1098_v63 = vrot.slane %v1097_v12, 4  ;;  %v1119_v25 = vadd.f32 %v1118_v62, %v1117_v46 }
 0x208   : > { %v1604_v60 = vpop.eup %1603  ;;  %v1135_v0 = vadd.f32 %v1134_v57, %v1133_v50  ;;  %v1014_v4 = vsel %vm995_vm9, %v1013_v58, %v1009_v20  ;;  %v1105_v8 = vsel %vm328_vm1, %v1075_v19, 0.0  ;;  %v1093_v27 = vrot.slane %v1092_v23, 1 }
 0x209   : > { %v1606_v7 = vpop.eup %1605  ;;  %v1082_v1 = vmul.f32 %v1604_v60, %v2053_v31  ;;  %v1045_v18 = vrot.slane %v1604_v60, %v2130_v10  ;;  %v1099_v2 = vadd.f32 %v1098_v63, %v1097_v12  ;;  %v1106_v24 = vadd.f32 %v1105_v8, %v1104_v41 }
 0x20a   : > { %v1083_v9 = vmul.f32 %v1606_v7, %v2061_v36  ;;  %v1136_v61 = vrot.slane %v1135_v0, 2  ;;  %v1049_v6 = vrot.slane %v1606_v7, %v2132_v11  ;;  %v1061_v14 = vsel %vm430_vm3, %v1014_v4, %v1060_v48 }
 0x20b   : > { %v1140_v3 = vsel %vm328_vm1, %v1082_v1, 0.0  ;;  %v1100_v16 = vrot.slane %v1099_v2, 2  ;;  %v1107_v31 = vrot.slane %v1106_v24, 4  ;;  %v1120_v44 = vrot.slane %v1119_v25, 1 }
 0x20c   : > { %v1608_v15 = vpop.eup %1607  ;;  %v1141_v17 = vsel %vm328_vm1, %v1083_v9, 0.0  ;;  %v1050_v37 = vsel %vm995_vm9, %v1049_v6, %v1045_v18  ;;  %v1137_v34 = vadd.f32 %v1136_v61, %v1135_v0  ;;  %v1130_v41 = vadd.f32 %v1129_v56, %v2240_v59 }
 0x20d   : > { %v1610_v26 = vpop.eup %1609  ;;  %v1142_v36 = vadd.f32 %v1141_v17, %v1140_v3  ;;  %v1084_v5 = vmul.f32 %v1608_v15, %v2073_v45  ;;  %v1101_v28 = vadd.f32 %v1100_v16, %v1099_v2  ;;  %v1108_v32 = vadd.f32 %v1107_v31, %v1106_v24 }
 0x20e   : > { %v1085_v33 = vmul.f32 %v1610_v26, %v2083_v54  ;;  %v1054_v40 = vrot.slane %v1608_v15, %v2130_v10  ;;  %v1058_v42 = vrot.slane %v1610_v26, %v2132_v11  ;;  %v1062_v54 = vsel %vm432_vm4, %v2217_v38, %v1061_v14 }
 0x20f   : > { %v1149_v35 = vsel %vm328_vm1, %v1084_v5, 0.0  ;;  %v1143_v39 = vrot.slane %v1142_v36, 4  ;;  %v1102_v30 = vrot.slane %v1101_v28, 1  ;;  %v1109_v43 = vrot.slane %v1108_v32, 2 }
 0x210   : > { %v1150_v45 = vsel %vm328_vm1, %v1085_v33, 0.0  ;;  %v1059_v46 = vsel %vm995_vm9, %v1058_v42, %v1054_v40  ;;  %v1094_v10 = vadd.f32 %v1093_v27, %v1092_v23  ;;  %v1063_v50 = vsel %vm434_vm5, %v2201_v13, %v1062_v54 }
 0x211   : > { %v1144_v22 = vadd.f32 %v1143_v39, %v1142_v36  ;;  %v1151_v21 = vadd.f32 %v1150_v45, %v1149_v35  ;;  %v1103_v49 = vadd.f32 %v1102_v30, %v1101_v28  ;;  %v1110_v11 = vadd.f32 %v1109_v43, %v1108_v32 }
 0x212   : > { %v1138_v29 = vrot.slane %v1137_v34, 1  ;;  %v1064_v53 = vsel %vm436_vm6, %v2230_v47, %v1063_v50  ;;  %v1121_v55 = vadd.f32 %v1120_v44, %v1119_v25  ;;  %v1158_v62 = vmul.f32 0.0625, %v1094_v10 }
 0x213   : > { %v1145_v51 = vrot.slane %v1144_v22, 2  ;;  %v1152_v52 = vrot.slane %v1151_v21, 4  ;;  %v1111_v20 = vrot.slane %v1110_v11, 1  ;;  %v1065_v38 = vsel %vm438_vm7, %v1050_v37, %v1064_v53 }
 0x214   : > { %v1159_v12 = vmul.f32 0.0625, %v1103_v49  ;;  %v1066_v47 = vsel %vm440_vm8, %v1059_v46, %v1065_v38  ;;  %v1139_v19 = vadd.f32 %v1138_v29, %v1137_v34 }
 0x215   : > { %v1146_v13 = vadd.f32 %v1145_v51, %v1144_v22  ;;  %v1153_v57 = vadd.f32 %v1152_v52, %v1151_v21  ;;  %v1112_v58 = vadd.f32 %v1111_v20, %v1110_v11  ;;  %1069 = vst.msk [vmem:[%s310_s16] sm:$0xff] %vm1068_vm10, %v1066_v47 }
 0x217   : > { %v1147_v48 = vrot.slane %v1146_v13, 1  ;;  %v1154_v60 = vrot.slane %v1153_v57, 2 }
 0x218   : > { %1704 = shalt.err (!%p1701_p3)
}
 0x219   : > { %s1705_s15 = scalar_lea.hbm %s2277_s11, 128  ;;  %s1709_s10 = scalar_lea.hbm %s2363_s6, 256 }
 0x21a   : > { %p1706_p11 = scmp.ne.s32.totalorder %s2277_s11, %s1705_s15  ;;  %p1710_p4 = scmp.lt.s32.totalorder %s2277_s11, %s2363_s6 }
 0x21b   : > { %p1711_p6 = scmp.lt.s32.totalorder %s1709_s10, %s1705_s15 }
 0x21c   : > { %p1707_p9 = pnand %p1706_p11, %p2382_p2 }
 0x21d   : > { %p1712_p8 = por %p1711_p6, %p1710_p4 }
 0x21e   : > { %p1708_p1 = pneg %p1707_p9 }
 0x220   : > { %p1713_p5 = pnand %p1712_p8, %p1708_p1 }
 0x222   : > { %1716 = shalt.err (!%p1713_p5)
}
 0x223   : > { %1481 = dma.vmem_to_hbm [thread:$0]  (%p2382_p2), %s2279_s8, 128, %s2277_s11, %s1189_s13   ;;  %v1160_v59 = vmul.f32 0.0625, %v1112_v58  ;;  %v1148_v63 = vadd.f32 %v1147_v48, %v1146_v13  ;;  %v1155_v0 = vadd.f32 %v1154_v60, %v1153_v57  ;;  %v1161_v4 = vmul.f32 0.0625, %v1121_v55 }
 0x224   : > { %v1174_v7 = vsel %vm428_vm2, %v1159_v12, %v1158_v62  ;;  %v1162_v23 = vmul.f32 0.0625, %v1130_v41  ;;  %v1163_v18 = vmul.f32 0.0625, %v1139_v19  ;;  %s303_s8 = scalar_lea.vmem [#allocation8], %s1349_s18  ;;  %s2318_s27 = scalar_lea.hbm %s2362_s5, %s1388_s20 }
 0x225   : > { %v1175_v8 = vsel %vm430_vm3, %v1160_v59, %v1174_v7  ;;  %v1156_v1 = vrot.slane %v1155_v0, 1  ;;  %v1164_v24 = vmul.f32 0.0625, %v1148_v63  ;;  %s1202_s11 = sshll.u32 %s303_s8, 4  ;;  %s1184_s29 = scalar_lea.sflag [#allocation4], %s1972_s12  ;;  %s1203_s11 = int_to_ptr.vmem [resolvable:$true] %s1202_s11 }
 0x226   : > { %v1176_v2 = vsel %vm432_vm4, %v1161_v4, %v1175_v8  ;;  %s1717_s15 = scalar_lea.vmem %s1203_s11, 128  ;;  %s1800_s18 = smov [#allocation8]  }
 0x227   : > { %v1177_v9 = vsel %vm434_vm5, %v1162_v23, %v1176_v2  ;;  %v1157_v61 = vadd.f32 %v1156_v1, %v1155_v0  ;;  %p1718_p7 = scmp.ne.s32.totalorder %s1203_s11, %s1717_s15  ;;  %s1721_s17 = sshll.u32 %s1800_s18, 4  ;;  %s1722_s17 = int_to_ptr.vmem [resolvable:$false] %s1721_s17 }
 0x228   : > { %v1178_v3 = vsel %vm436_vm6, %v1163_v18, %v1177_v9  ;;  %s1723_s25 = scalar_lea.vmem %s1722_s17, 256  ;;  %p1724_p0 = scmp.lt.s32.totalorder %s1203_s11, %s1722_s17 }
 0x229   : > { %v1165_v56 = vmul.f32 0.0625, %v1157_v61  ;;  %v1179_v6 = vsel %vm438_vm7, %v1164_v24, %v1178_v3  ;;  %p1719_p12 = pnand %p1718_p7, %p2382_p2  ;;  %p1725_p10 = scmp.lt.s32.totalorder %s1723_s25, %s1717_s15 }
 0x22b   : > { %v1180_v14 = vsel %vm440_vm8, %v1165_v56, %v1179_v6  ;;  %p1720_p13 = pneg %p1719_p12  ;;  %p1726_p3 = por %p1725_p10, %p1724_p0 }
 0x22c   : > { %1182 = vst.msk [vmem:[%s303_s8] sm:$0xff] %vm328_vm1, %v1180_v14 }
 0x22d   : > { %p1727_p11 = pnand %p1726_p3, %p1720_p13 }
 0x22f   : > { %1730 = shalt.err (!%p1727_p11)
}
 0x230   : > { %s1731_s20 = scalar_lea.hbm %s2318_s27, 128  ;;  %s1735_s10 = scalar_lea.hbm %s2362_s5, 256 }
 0x231   : > { %p1732_p9 = scmp.ne.s32.totalorder %s2318_s27, %s1731_s20  ;;  %p1736_p6 = scmp.lt.s32.totalorder %s2318_s27, %s2362_s5 }
 0x232   : > { %p1737_p8 = scmp.lt.s32.totalorder %s1735_s10, %s1731_s20 }
 0x233   : > { %p1733_p1 = pnand %p1732_p9, %p2382_p2 }
 0x234   : > { %p1738_p5 = por %p1737_p8, %p1736_p6 }
 0x235   : > { %p1734_p4 = pneg %p1733_p1 }
 0x237   : > { %p1739_p7 = pnand %p1738_p5, %p1734_p4 }
 0x239   : > { %1742 = shalt.err (!%p1739_p7)
}
 0x23a   : > { %1480 = dma.vmem_to_hbm [thread:$0]  (%p2382_p2), %s1203_s11, 128, %s2318_s27, %s1184_s29  }
 0x23b PF: > { %s1227_s8 = sand.u32 1, %s1777_s21   ;;  %p2383_p12 = scmp.ne.s32.totalorder %s2371_s28, 0 }
 0x23c   : > { %p2384_p13 = scmp.ge.s32.totalorder %s1789_s24, 2  ;;  %s1228_s13 = scalar_lea.sflag [#allocation4], %s1227_s8 }
 0x23e   : > { %p1496_p0 = pnand %p2384_p13, %p2383_p12 }
 0x240   : > { %p1497_p10 = pneg %p1496_p0 }
 0x242   : > { %1768 = dma.done.wait (%p1497_p10), %s1228_s13, 128  }
 0x243   : > { %1770 = vsyncadd (%p1497_p10), %s1228_s13, 4294967168  ;;  %s1237_s9 = scalar_lea.sflag [#allocation10], %s1227_s8 }
 0x244   : > { %1772 = dma.done.wait (%p1497_p10), %s1237_s9, 128  }
 0x245   : > { %1774 = vsyncadd (%p1497_p10), %s1237_s9, 4294967168  ;;  %p24_p2 = scmp.ge.s32.totalorder %s1914_s19, 4   ;;  %s2385_s21 = smov %s1781_s22 }
 0x246   : > { %s2386_s22 = smov %s1785_s23  ;;  %s2387_s23 = smov %s1930_s7 }
 0x247   : > { %s2388_s24 = smov %s1914_s19  ;;  %26 = sbr.rel (!%p24_p2) target bundleno = 8 (0x8), region = 110 }
 0x24c   :  { %1242 = vsyncpa [#allocation3], 1 }
 0x24d   :  { %1244 = vsyncpa [#allocation3 + $0x1], 1 }
 0x24e   :  { %1245 = vsyncpa [#allocation6], 1 }
 0x24f   :  { %1246 = vsyncpa [#allocation4], 1 }
 0x250   :  { %1248 = vsyncpa [#allocation4 + $0x1], 1 }
 0x251   :  { %1249 = vsyncpa [#allocation10], 1 }
 0x252   :  { %1251 = vsyncpa [#allocation10 + $0x1], 1 }

</bundles_post_ra>
